<compile_context>
chip_gen: v7x
topology: tpu7x:2x2x1
jax: 0.10.0
libtpu: 0.0.40
codegen_flags: <defaults>
</compile_context>

<pallas_src>
import sys
import numpy as np
import jax
import jax.numpy as jnp
from jax.experimental import pallas as pl
from jax.experimental.pallas import tpu as pltpu


# ---------------------------------------------------------------------------
# Kernels
# ---------------------------------------------------------------------------
def ffn_kernel_single(x_ref, w1_ref, b1_ref, w2_ref, b2_ref, o_ref):
    """Hidden dim fully resident (h-axis has one step): single fused pass."""
    xb = x_ref[...].astype(jnp.bfloat16)                 # VPU cast, hidden under MXU
    h = jnp.dot(xb, w1_ref[...], preferred_element_type=jnp.float32)
    h = jnp.maximum(h + b1_ref[...], 0.0)
    out = jnp.dot(h.astype(jnp.bfloat16), w2_ref[...],
                  preferred_element_type=jnp.float32)
    o_ref[...] = (out + b2_ref[...]).astype(o_ref.dtype)


def ffn_kernel_acc_out(x_ref, w1_ref, b1_ref, w2_ref, b2_ref, o_ref):
    """H tiled, f32 output: accumulate directly into the resident o_ref block."""
    h_idx = pl.program_id(1)

    @pl.when(h_idx == 0)
    def _init():
        o_ref[...] = jnp.broadcast_to(b2_ref[...], o_ref.shape).astype(o_ref.dtype)

    xb = x_ref[...].astype(jnp.bfloat16)
    h = jnp.dot(xb, w1_ref[...], preferred_element_type=jnp.float32)
    h = jnp.maximum(h + b1_ref[...], 0.0)
    o_ref[...] += jnp.dot(h.astype(jnp.bfloat16), w2_ref[...],
                          preferred_element_type=jnp.float32)


def ffn_kernel_acc_scratch(x_ref, w1_ref, b1_ref, w2_ref, b2_ref, o_ref, acc_ref):
    """H tiled, narrow output dtype: f32 VMEM accumulator, cast once at the end."""
    h_idx = pl.program_id(1)

    @pl.when(h_idx == 0)
    def _init():
        acc_ref[...] = jnp.broadcast_to(b2_ref[...], acc_ref.shape)

    xb = x_ref[...].astype(jnp.bfloat16)
    h = jnp.dot(xb, w1_ref[...], preferred_element_type=jnp.float32)
    h = jnp.maximum(h + b1_ref[...], 0.0)
    acc_ref[...] += jnp.dot(h.astype(jnp.bfloat16), w2_ref[...],
                            preferred_element_type=jnp.float32)

    @pl.when(h_idx == pl.num_programs(1) - 1)
    def _finalize():
        o_ref[...] = acc_ref[...].astype(o_ref.dtype)


# ---------------------------------------------------------------------------
# VMEM planning
# ---------------------------------------------------------------------------
def _round_down(v, m):
    return max(m, (v // m) * m)


def _vmem_capacity_bytes():
    try:
        info = pltpu.get_tpu_info()
        for attr in ("vmem_capacity_bytes", "vmem_bytes", "vmem_size_bytes"):
            v = getattr(info, attr, None)
            if v:
                return int(v)
    except Exception:
        pass
    return 64 * 1024 * 1024  # conservative floor: v7x per-TensorCore VMEM


def _estimate_tile_vmem(tm, th, C, H, x_itemsize, out_itemsize, out_needs_scratch):
    """Rough resident-VMEM estimate for one pipeline configuration."""
    n_h = max(1, H // th)
    wbuf = 1 if n_h == 1 else 2                    # Buffered(1) when weights resident
    weights = wbuf * 2 * (C * th) * 2              # bf16 W1(C,th) + W2(th,C) blocks
    biases = wbuf * th * 4 + C * 4
    x_blk = 2 * tm * C * x_itemsize                # double-buffered input rows
    o_blk = 2 * tm * C * out_itemsize              # double-buffered output rows
    acc = tm * C * 4 if (out_needs_scratch and n_h > 1) else 0
    h_tmp = tm * th * (4 + 2)                      # f32 intermediate + bf16 recast
    x_cast = tm * C * 2                            # in-kernel bf16 copy of x tile
    return weights + biases + x_blk + o_blk + acc + h_tmp + x_cast


def _plan_tiles(M, C, H, x_itemsize, out_itemsize, out_needs_scratch, vmem_cap):
    """Pick (tm, th, est_bytes). Prefer fully resident weights (th = H)."""
    budget = int(0.75 * vmem_cap)

    def est(tm, th):
        return _estimate_tile_vmem(tm, th, C, H, x_itemsize, out_itemsize,
                                   out_needs_scratch)

    # Row-tile cap: keep the "parallel" row axis >= 2 steps when M allows, so
    # both v7x TensorCores get work.
    tm_cap = M
    if M >= 16:
        tm_cap = min(tm_cap, _round_down(M // 2, 8))

    def rows(target):
        t = max(8, min(target, tm_cap))
        mult = 256 if t >= 256 else (128 if t >= 128 else 8)
        return max(8, (t // mult) * mult)

    # Path 1: weights fully resident -> fetched exactly once for the whole grid.
    for tgt in (512, 384, 256, 128, 64, 32, 16, 8):
        tm = rows(tgt)
        if est(tm, H) <= budget:
            return tm, H, est(tm, H)
        if tm <= 8:
            break

    # Path 2: tile H (weights re-streamed per row tile). Intensity ~ tm FLOP/byte,
    # so favor the largest row tile that fits, then the largest lane-aligned th.
    th_cands = [t for t in (2048, 1024, 768, 512, 384, 256, 128)
                if t <= H and H % t == 0] or [H]
    for tgt in (768, 512, 384, 256, 128, 64, 32, 16, 8):
        tm = rows(tgt)
        for th in th_cands:
            if est(tm, th) <= budget:
                return tm, th, est(tm, th)
    tm, th = rows(8), th_cands[-1]
    return tm, th, est(tm, th)


# ---------------------------------------------------------------------------
# pallas_call builder + wrapper
# ---------------------------------------------------------------------------
def _build_ffn_call(M, C, H, tm, th, out_dtype, vmem_limit, single_buffer_consts):
    n_m, n_h = M // tm, H // th
    weights_const = (n_h == 1)
    out_is_f32 = np.dtype(out_dtype) == np.dtype(np.float32)

    if n_h == 1:
        kernel, scratch = ffn_kernel_single, []
    elif out_is_f32:
        kernel, scratch = ffn_kernel_acc_out, []          # accumulate in o_ref
    else:
        kernel, scratch = ffn_kernel_acc_scratch, [pltpu.VMEM((tm, C), jnp.float32)]

    def spec(shape, index_map, constant):
        if single_buffer_consts and constant:
            return pl.BlockSpec(shape, index_map, pipeline_mode=pl.Buffered(1))
        return pl.BlockSpec(shape, index_map)

    grid_spec = pltpu.PrefetchScalarGridSpec(
        num_scalar_prefetch=0,
        grid=(n_m, n_h),
        in_specs=[
            pl.BlockSpec((tm, C), lambda i, h: (i, 0)),          # x rows (streamed)
            spec((C, th), lambda i, h: (0, h), weights_const),   # W1 slice
            spec((1, th), lambda i, h: (0, h), weights_const),   # b1 slice
            spec((th, C), lambda i, h: (h, 0), weights_const),   # W2 slice
            spec((1, C), lambda i, h: (0, 0), True),             # b2 (always constant)
        ],
        out_specs=pl.BlockSpec((tm, C), lambda i, h: (i, 0)),
        scratch_shapes=scratch,
    )
    return pl.pallas_call(
        kernel,
        out_shape=jax.ShapeDtypeStruct((M, C), out_dtype),
        grid_spec=grid_spec,
        compiler_params=pltpu.CompilerParams(
            dimension_semantics=("parallel", "arbitrary"),
            vmem_limit_bytes=int(vmem_limit),
        ),
    )


def prepare_params(w1, b1, w2, b2):
    """One-time (outside the hot path) bf16 weight cast + bias reshape.

    w1: (C, H), b1: (H,), w2: (H, C), b2: (C,) -- i.e. torch Linear weights
    transposed to (in, out)."""
    return (w1.astype(jnp.bfloat16),
            b1.reshape(1, -1).astype(jnp.float32),
            w2.astype(jnp.bfloat16),
            b2.reshape(1, -1).astype(jnp.float32))


def feed_forward(x, params, *, out_dtype=None, tm=None, th=None):
    """x: (B, T, C). params: from prepare_params(). Returns (B, T, C).

    out_dtype defaults to x.dtype; pass jnp.bfloat16 if the consumer tolerates a
    bf16 output (halves writeback + output VMEM)."""
    w1b, b1_2d, w2b, b2_2d = params
    B, T, C = x.shape
    H = w1b.shape[1]
    M = B * T
    out_dtype = x.dtype if out_dtype is None else out_dtype

    x_isz = np.dtype(x.dtype).itemsize
    o_isz = np.dtype(out_dtype).itemsize
    needs_scratch = np.dtype(out_dtype) != np.dtype(np.float32)

    vmem_cap = _vmem_capacity_bytes()
    tm_p, th_p, _ = _plan_tiles(M, C, H, x_isz, o_isz, needs_scratch, vmem_cap)

    tm_eff = tm_p if tm is None else max(8, (min(tm, max(M, 8)) // 8) * 8)
    th_eff = th_p if th is None else th
    if th_eff != H and (th_eff % 128 != 0 or H % th_eff != 0):
        th_eff = H  # lane alignment / divisibility fallback

    est = _estimate_tile_vmem(tm_eff, th_eff, C, H, x_isz, o_isz, needs_scratch)
    vmem_limit = min(int(0.9 * vmem_cap), max(int(1.5 * est) + (4 << 20), 32 << 20))

    M_pad = pl.cdiv(M, tm_eff) * tm_eff
    x2 = x.reshape(M, C)                       # no dtype cast here; kernel casts
    if M_pad != M:
        x2 = jnp.pad(x2, ((0, M_pad - M), (0, 0)))

    args = (x2, w1b, b1_2d, w2b, b2_2d)
    try:
        out = _build_ffn_call(M_pad, C, H, tm_eff, th_eff, out_dtype,
                              vmem_limit, single_buffer_consts=True)(*args)
    except Exception as e:  # e.g. pl.Buffered(1) hint unsupported by this jax build
        print(f"[feed_forward] single-buffer hint failed ({type(e).__name__}: {e}); "
              "rebuilding with default double-buffering", file=sys.stderr, flush=True)
        out = _build_ffn_call(M_pad, C, H, tm_eff, th_eff, out_dtype,
                              vmem_limit, single_buffer_consts=False)(*args)
    return out[:M].reshape(B, T, C)


# ---------------------------------------------------------------------------
# Reference + init
# ---------------------------------------------------------------------------
def ffn_reference(x, w1, b1, w2, b2):
    """Pure-JAX reference mirroring the kernel's bf16-MXU / f32-accumulate numerics."""
    C = x.shape[-1]
    xb = x.reshape(-1, C).astype(jnp.bfloat16)
    h = jnp.maximum(jnp.dot(xb, w1.astype(jnp.bfloat16),
                            preferred_element_type=jnp.float32) + b1, 0.0)
    r = jnp.dot(h.astype(jnp.bfloat16), w2.astype(jnp.bfloat16),
                preferred_element_type=jnp.float32) + b2
    return r.reshape(x.shape)


def init_params(key, n_embed):
    """Deterministic init mimicking torch.nn.Linear default U(-1/sqrt(in), 1/sqrt(in))."""
    hidden = 4 * n_embed
    k1, k2, k3, k4 = jax.random.split(key, 4)
    bound1 = 1.0 / jnp.sqrt(n_embed)
    bound2 = 1.0 / jnp.sqrt(hidden)
    w1 = jax.random.uniform(k1, (n_embed, hidden), jnp.float32, -bound1, bound1)
    b1 = jax.random.uniform(k2, (hidden,), jnp.float32, -bound1, bound1)
    w2 = jax.random.uniform(k3, (hidden, n_embed), jnp.float32, -bound2, bound2)
    b2 = jax.random.uniform(k4, (n_embed,), jnp.float32, -bound2, bound2)
    return w1, b1, w2, b2


if __name__ == "__main__":
    B, T, n_embed = 2, 8, 32
    dropout = 0.1  # identity at inference

    key = jax.random.PRNGKey(0)
    kx, kp, kx2, kp2 = jax.random.split(key, 4)

    # 1) Planner path: weights fully resident (th = H), single fused pass.
    x = jax.random.normal(kx, (B, T, n_embed), jnp.float32)
    w1, b1, w2, b2 = init_params(kp, n_embed)
    params = prepare_params(w1, b1, w2, b2)

    out = jax.block_until_ready(feed_forward(x, params))
    assert out.shape == (B, T, n_embed) and out.dtype == x.dtype
    ref = ffn_reference(x, w1, b1, w2, b2)
    err = float(jnp.max(jnp.abs(out - ref)))
    assert jnp.allclose(out, ref, atol=5e-3, rtol=5e-3), f"max abs err {err}"

    # 2) Forced H-tiling (th < H) to exercise the resident-output accumulator path.
    n_embed2 = 64  # H = 256 -> two 128-wide hidden slices
    xb2 = jax.random.normal(kx2, (B, T, n_embed2), jnp.float32)
    w1_2, b1_2, w2_2, b2_2 = init_params(kp2, n_embed2)
    params2 = prepare_params(w1_2, b1_2, w2_2, b2_2)

    out2 = jax.block_until_ready(feed_forward(xb2, params2, tm=8, th=128))
    ref2 = ffn_reference(xb2, w1_2, b1_2, w2_2, b2_2)
    err2 = float(jnp.max(jnp.abs(out2 - ref2)))
    assert jnp.allclose(out2, ref2, atol=5e-3, rtol=5e-3), f"max abs err {err2}"

    print("KERNEL_OK")
</pallas_src>

<mosaic_0001>
module attributes {stable_mosaic.version = 11 : i64} {
  func.func @ffn_kernel_single(%arg0: i32, %arg1: i32, %arg2: memref<8x32xf32, #tpu.memory_space<vmem>>, %arg3: memref<32x128xbf16, #tpu.memory_space<vmem>>, %arg4: memref<1x128xf32, #tpu.memory_space<vmem>>, %arg5: memref<128x32xbf16, #tpu.memory_space<vmem>>, %arg6: memref<1x32xf32, #tpu.memory_space<vmem>>, %arg7: memref<8x32xf32, #tpu.memory_space<vmem>>) attributes {dimension_semantics = [#tpu.dimension_semantics<parallel>, #tpu.dimension_semantics<arbitrary>], iteration_bounds = array<i64: 2, 1>, scalar_prefetch = 0 : i64, scratch_operands = 0 : i64, tpu.core_type = #tpu.core_type<tc>, window_params = [{transform_indices = @transform_0, window_bounds = array<i64: 8, 32>}, {pipeline_mode = #tpu.pipeline_mode<synchronous>, transform_indices = @transform_1, window_bounds = array<i64: 32, 128>}, {pipeline_mode = #tpu.pipeline_mode<synchronous>, transform_indices = @transform_2, window_bounds = array<i64: 1, 128>}, {pipeline_mode = #tpu.pipeline_mode<synchronous>, transform_indices = @transform_3, window_bounds = array<i64: 128, 32>}, {pipeline_mode = #tpu.pipeline_mode<synchronous>, transform_indices = @transform_4, window_bounds = array<i64: 1, 32>}, {transform_indices = @transform_5, window_bounds = array<i64: 8, 32>}]} {
    %c0 = arith.constant 0 : index
    %c0_0 = arith.constant 0 : index
    %0 = vector.load %arg2[%c0, %c0_0] : memref<8x32xf32, #tpu.memory_space<vmem>>, vector<8x32xf32>
    %1 = arith.truncf %0 : vector<8x32xf32> to vector<8x32xbf16>
    %c0_1 = arith.constant 0 : index
    %c0_2 = arith.constant 0 : index
    %2 = vector.load %arg3[%c0_1, %c0_2] : memref<32x128xbf16, #tpu.memory_space<vmem>>, vector<32x128xbf16>
    %cst = arith.constant dense<0.000000e+00> : vector<8x128xf32>
    %3 = tpu.matmul %1, %2, %cst {dimension_numbers = #tpu.dot_dimension_numbers<[1], [0], [0], [1], [0, 0, 1, 1], [], []>} : vector<8x32xbf16>, vector<32x128xbf16>, vector<8x128xf32> -> vector<8x128xf32>
    %c0_3 = arith.constant 0 : index
    %c0_4 = arith.constant 0 : index
    %4 = vector.load %arg4[%c0_3, %c0_4] : memref<1x128xf32, #tpu.memory_space<vmem>>, vector<1x128xf32>
    %5 = vector.broadcast %4 : vector<1x128xf32> to vector<8x128xf32>
    %6 = arith.addf %3, %5 : vector<8x128xf32>
    %cst_5 = arith.constant 0.000000e+00 : f32
    %7 = vector.broadcast %cst_5 : f32 to vector<8x128xf32>
    %8 = arith.maximumf %6, %7 : vector<8x128xf32>
    %9 = arith.truncf %8 : vector<8x128xf32> to vector<8x128xbf16>
    %c0_6 = arith.constant 0 : index
    %c0_7 = arith.constant 0 : index
    %10 = vector.load %arg5[%c0_6, %c0_7] : memref<128x32xbf16, #tpu.memory_space<vmem>>, vector<128x32xbf16>
    %cst_8 = arith.constant dense<0.000000e+00> : vector<8x32xf32>
    %11 = tpu.matmul %9, %10, %cst_8 {dimension_numbers = #tpu.dot_dimension_numbers<[1], [0], [0], [1], [0, 0, 1, 1], [], []>} : vector<8x128xbf16>, vector<128x32xbf16>, vector<8x32xf32> -> vector<8x32xf32>
    %c0_9 = arith.constant 0 : index
    %c0_10 = arith.constant 0 : index
    %12 = vector.load %arg6[%c0_9, %c0_10] : memref<1x32xf32, #tpu.memory_space<vmem>>, vector<1x32xf32>
    %13 = vector.broadcast %12 : vector<1x32xf32> to vector<8x32xf32>
    %14 = arith.addf %11, %13 : vector<8x32xf32>
    %c0_11 = arith.constant 0 : index
    %c0_12 = arith.constant 0 : index
    %15 = vector.load %arg7[%c0_11, %c0_12] : memref<8x32xf32, #tpu.memory_space<vmem>>, vector<8x32xf32>
    tpu.vector_store %arg7[%c0_11, %c0_12], %14 {strides = array<i32>} : memref<8x32xf32, #tpu.memory_space<vmem>>, vector<8x32xf32>,
    return
  }
  func.func @transform_0(%arg0: i32, %arg1: i32) -> (i32, i32) {
    %c0_i32 = arith.constant 0 : i32
    %c0_i32_0 = arith.constant 0 : i32
    return %arg0, %c0_i32 : i32, i32
  }
  func.func @transform_1(%arg0: i32, %arg1: i32) -> (i32, i32) {
    %c0_i32 = arith.constant 0 : i32
    %c0_i32_0 = arith.constant 0 : i32
    return %c0_i32, %arg1 : i32, i32
  }
  func.func @transform_2(%arg0: i32, %arg1: i32) -> (i32, i32) {
    %c0_i32 = arith.constant 0 : i32
    %c0_i32_0 = arith.constant 0 : i32
    return %c0_i32, %arg1 : i32, i32
  }
  func.func @transform_3(%arg0: i32, %arg1: i32) -> (i32, i32) {
    %c0_i32 = arith.constant 0 : i32
    %c0_i32_0 = arith.constant 0 : i32
    return %arg1, %c0_i32 : i32, i32
  }
  func.func @transform_4(%arg0: i32, %arg1: i32) -> (i32, i32) {
    %c0_i32 = arith.constant 0 : i32
    %c0_i32_0 = arith.constant 0 : i32
    %c0_i32_1 = arith.constant 0 : i32
    return %c0_i32, %c0_i32_0 : i32, i32
  }
  func.func @transform_5(%arg0: i32, %arg1: i32) -> (i32, i32) {
    %c0_i32 = arith.constant 0 : i32
    %c0_i32_0 = arith.constant 0 : i32
    return %arg0, %c0_i32 : i32, i32
  }
}

module attributes {stable_mosaic.version = 11 : i64} {
  func.func @ffn_kernel_single(%arg0: i32, %arg1: i32, %arg2: memref<8x32xf32, #tpu.memory_space<vmem>>, %arg3: memref<32x128xbf16, #tpu.memory_space<vmem>>, %arg4: memref<1x128xf32, #tpu.memory_space<vmem>>, %arg5: memref<128x32xbf16, #tpu.memory_space<vmem>>, %arg6: memref<1x32xf32, #tpu.memory_space<vmem>>, %arg7: memref<8x32xf32, #tpu.memory_space<vmem>>) attributes {dimension_semantics = [#tpu.dimension_semantics<parallel>, #tpu.dimension_semantics<arbitrary>], iteration_bounds = array<i64: 2, 1>, scalar_prefetch = 0 : i64, scratch_operands = 0 : i64, tpu.core_type = #tpu.core_type<tc>, window_params = [{transform_indices = @transform_0, window_bounds = array<i64: 8, 32>}, {transform_indices = @transform_1, window_bounds = array<i64: 32, 128>}, {transform_indices = @transform_2, window_bounds = array<i64: 1, 128>}, {transform_indices = @transform_3, window_bounds = array<i64: 128, 32>}, {pipeline_mode = #tpu.pipeline_mode<synchronous>, transform_indices = @transform_4, window_bounds = array<i64: 1, 32>}, {transform_indices = @transform_5, window_bounds = array<i64: 8, 32>}]} {
    %c0 = arith.constant 0 : index
    %c0_0 = arith.constant 0 : index
    %0 = vector.load %arg2[%c0, %c0_0] : memref<8x32xf32, #tpu.memory_space<vmem>>, vector<8x32xf32>
    %1 = arith.truncf %0 : vector<8x32xf32> to vector<8x32xbf16>
    %c0_1 = arith.constant 0 : index
    %c0_2 = arith.constant 0 : index
    %2 = vector.load %arg3[%c0_1, %c0_2] : memref<32x128xbf16, #tpu.memory_space<vmem>>, vector<32x128xbf16>
    %cst = arith.constant dense<0.000000e+00> : vector<8x128xf32>
    %3 = tpu.matmul %1, %2, %cst {dimension_numbers = #tpu.dot_dimension_numbers<[1], [0], [0], [1], [0, 0, 1, 1], [], []>} : vector<8x32xbf16>, vector<32x128xbf16>, vector<8x128xf32> -> vector<8x128xf32>
    %c0_3 = arith.constant 0 : index
    %c0_4 = arith.constant 0 : index
    %4 = vector.load %arg4[%c0_3, %c0_4] : memref<1x128xf32, #tpu.memory_space<vmem>>, vector<1x128xf32>
    %5 = vector.broadcast %4 : vector<1x128xf32> to vector<8x128xf32>
    %6 = arith.addf %3, %5 : vector<8x128xf32>
    %cst_5 = arith.constant 0.000000e+00 : f32
    %7 = vector.broadcast %cst_5 : f32 to vector<8x128xf32>
    %8 = arith.maximumf %6, %7 : vector<8x128xf32>
    %9 = arith.truncf %8 : vector<8x128xf32> to vector<8x128xbf16>
    %c0_6 = arith.constant 0 : index
    %c0_7 = arith.constant 0 : index
    %10 = vector.load %arg5[%c0_6, %c0_7] : memref<128x32xbf16, #tpu.memory_space<vmem>>, vector<128x32xbf16>
    %cst_8 = arith.constant dense<0.000000e+00> : vector<8x32xf32>
    %11 = tpu.matmul %9, %10, %cst_8 {dimension_numbers = #tpu.dot_dimension_numbers<[1], [0], [0], [1], [0, 0, 1, 1], [], []>} : vector<8x128xbf16>, vector<128x32xbf16>, vector<8x32xf32> -> vector<8x32xf32>
    %c0_9 = arith.constant 0 : index
    %c0_10 = arith.constant 0 : index
    %12 = vector.load %arg6[%c0_9, %c0_10] : memref<1x32xf32, #tpu.memory_space<vmem>>, vector<1x32xf32>
    %13 = vector.broadcast %12 : vector<1x32xf32> to vector<8x32xf32>
    %14 = arith.addf %11, %13 : vector<8x32xf32>
    %c0_11 = arith.constant 0 : index
    %c0_12 = arith.constant 0 : index
    %15 = vector.load %arg7[%c0_11, %c0_12] : memref<8x32xf32, #tpu.memory_space<vmem>>, vector<8x32xf32>
    tpu.vector_store %arg7[%c0_11, %c0_12], %14 {strides = array<i32>} : memref<8x32xf32, #tpu.memory_space<vmem>>, vector<8x32xf32>,
    return
  }
  func.func @transform_0(%arg0: i32, %arg1: i32) -> (i32, i32) {
    %c0_i32 = arith.constant 0 : i32
    %c0_i32_0 = arith.constant 0 : i32
    return %arg0, %c0_i32 : i32, i32
  }
  func.func @transform_1(%arg0: i32, %arg1: i32) -> (i32, i32) {
    %c0_i32 = arith.constant 0 : i32
    %c0_i32_0 = arith.constant 0 : i32
    return %c0_i32, %arg1 : i32, i32
  }
  func.func @transform_2(%arg0: i32, %arg1: i32) -> (i32, i32) {
    %c0_i32 = arith.constant 0 : i32
    %c0_i32_0 = arith.constant 0 : i32
    return %c0_i32, %arg1 : i32, i32
  }
  func.func @transform_3(%arg0: i32, %arg1: i32) -> (i32, i32) {
    %c0_i32 = arith.constant 0 : i32
    %c0_i32_0 = arith.constant 0 : i32
    return %arg1, %c0_i32 : i32, i32
  }
  func.func @transform_4(%arg0: i32, %arg1: i32) -> (i32, i32) {
    %c0_i32 = arith.constant 0 : i32
    %c0_i32_0 = arith.constant 0 : i32
    %c0_i32_1 = arith.constant 0 : i32
    return %c0_i32, %c0_i32_0 : i32, i32
  }
  func.func @transform_5(%arg0: i32, %arg1: i32) -> (i32, i32) {
    %c0_i32 = arith.constant 0 : i32
    %c0_i32_0 = arith.constant 0 : i32
    return %arg0, %c0_i32 : i32, i32
  }
}

</mosaic_0001>

<bundles_post_ra>
// kernel: tpu_custom_call.1
= control target key start
LH: loop header
LB: loop body
LE: loop exit
PB: predicated region body
PF: predicated region fallthrough
CT: control target
= control target key end

     0   :  { %10 = vsyncpa [#allocation3], 0  ;;  %s989_s0 = inlined_call_operand.vmem [shape: f32[16,32], index: 0, kind: input, shape index: {}]   ;;  %s990_s1 = inlined_call_operand.vmem [shape: bf16[32,128], index: 1, kind: input, shape index: {}]   ;;  %s991_s2 = inlined_call_operand.vmem [shape: f32[1,128], index: 2, kind: input, shape index: {}]   ;;  %s992_s3 = inlined_call_operand.vmem [shape: bf16[128,32], index: 3, kind: input, shape index: {}]   ;;  %s993_s4 = inlined_call_operand.vmem [shape: f32[1,32], index: 4, kind: input, shape index: {}]   ;;  %s994_s5 = inlined_call_operand.hbm [shape: f32[16,32], index: 5, kind: output, shape index: {}]  }
   0x1   :  { %12 = vsyncpa [#allocation3 + $0x1], 0  ;;  %s839_s18 = smov 0   ;;  %s841_s19 = smov 0  }
   0x2   :  { %s843_s20 = smov 0   ;;  %s845_s21 = smov 0  }
   0x3   :  { %s847_s22 = smov 0   ;;  %s849_s23 = smov 0  }
   0x4 LB: > { %s592_s24 = sadd.s32 4294967295, %s804_s23   ;;  %s593_s25 = sadd.s32 4294967294, %s804_s23   ;;  %s804_s23 = sphi %s849_s23, %s18_s23   ;;  %s800_s22 = sphi %s847_s22, %s1001_s22   ;;  %s796_s21 = sphi %s845_s21, %s1000_s21   ;;  %s792_s20 = sphi %s843_s20, %s999_s20   ;;  %s788_s19 = sphi %s841_s19, %s998_s19   ;;  %s784_s18 = sphi %s839_s18, %s997_s18  }
   0x5   : > { %s30_s26 = sadd.s32 1, %s800_s22  ;;  %s162_s27 = sadd.s32 1, %s792_s20 }
   0x6   : > { %p32_p0 = scmp.ge.s32.totalorder %s30_s26, 2  ;;  %p172_p1 = scmp.ne.s32.totalorder %s792_s20, %s788_s19 }
   0x7   : > { %p173_p2 = scmp.eq.s32.totalorder %s592_s24, 1  ;;  %p178_p3 = scmp.ne.s32.totalorder %s788_s19, %s784_s18 }
   0x8   : > { %s1003_s26 = smov (%p32_p0, %s30_s26), 0  ;;  %p179_p5 = scmp.eq.s32.totalorder %s593_s25, 1 }
   0x9   : > { %p879_p4 = por %p173_p2, %p172_p1  ;;  %s159_s29 = ssub.s32 %s800_s22, %s1003_s26 }
   0xa   : > { %p599_p6 = scmp.ge.s32.totalorder %s804_s23, 1  ;;  %p160_p7 = scmp.eq.s32.totalorder %s159_s29, 0 }
   0xb   : > { %p886_p8 = por %p179_p5, %p178_p3  ;;  %p229_p9 = scmp.lt.s32.totalorder %s804_s23, 3 }
   0xc   : > { %s892_s6 = scalar_select %p160_p7, %s792_s20, %s162_s27  }
   0xd   : > { %p230_p10 = pnand %p599_p6, %p229_p9 }
   0xe   : > { %v716_v0 = vld [vmem:[%s990_s1] sm:$0xff] (!%p230_p10)   ;;  %v806_v1 = vmov (!%p230_p10), 0.0   ;;  %v717_v2 = vld [vmem:[%s990_s1 + $0x8] sm:$0xff] (!%p230_p10)   ;;  %vm807_vm0 = vmmov (!%p230_p10), 0   ;;  %p268_p11 = scmp.lt.s32.totalorder (!%p230_p10), %s796_s21, 1  ;;  %vm311_vm1 = vcmask (!%p230_p10), 261120  }
   0xf   : > { %233 = sbr.rel (%p230_p10) target bundleno = 475 (0x1db), region = 40  ;;  %631 = vmatprep.subr.bf16.mxu0 (!%p230_p10), %v806_v1  ;;  %639 = vmatprep.subr.bf16.mxu1 (!%p230_p10), %v806_v1  ;;  %v718_v3 = vld [vmem:[%s992_s3] sm:$0xff] (!%p230_p10)   ;;  %v719_v4 = vld [vmem:[%s992_s3 + $0x8] sm:$0xff] (!%p230_p10)   ;;  %v720_v6 = vld [vmem:[%s992_s3 + $0x10] sm:$0xff] (!%p230_p10)   ;;  %s616_s8 = sshll.u32 (!%p230_p10), %s796_s21, 7 }
  0x10   : > { %632 = vmatpush3.bf16.msra.mxu0 (!%p230_p10), %v716_v0  ;;  %635 = vmatprep.mubr.msk.bf16.mxu0 (!%p230_p10), %vm807_vm0, %v806_v1  ;;  %v721_v8 = vld [vmem:[%s992_s3 + $0x18] sm:$0xff] (!%p230_p10)   ;;  %v722_v9 = vld [vmem:[%s992_s3 + $0x20] sm:$0xff] (!%p230_p10)   ;;  %v723_v10 = vld [vmem:[%s992_s3 + $0x28] sm:$0xff] (!%p230_p10)   ;;  %s808_s15 = smov (!%p230_p10), [#allocation2]  }
  0x11   : > { %633 = vmatprep.subr.bf16.mxu0 (!%p230_p10), %v806_v1  ;;  %655 = vmatprep.mubr.msk.bf16.mxu1 (!%p230_p10), %vm807_vm0, %v806_v1  ;;  %v724_v11 = vld [vmem:[%s992_s3 + $0x30] sm:$0xff] (!%p230_p10)   ;;  %v725_v12 = vld [vmem:[%s992_s3 + $0x38] sm:$0xff] (!%p230_p10)   ;;  %v602_v13 = vld [vmem:[%s991_s2] ss:$0 sm:$0xff] (!%p230_p10) }
  0x12   : > { %640 = vmatpush3.bf16.msra.mxu1 (!%p230_p10), %v718_v3  ;;  %v606_v21 = vld [vmem:[%s993_s4] ss:$0 sm:$0xff] (!%p230_p10) }
  0x13   : > { %641 = vmatprep.subr.bf16.mxu1 (!%p230_p10), %v806_v1 }
  0x14   : > { %634 = vmatpush3.bf16.msra.mxu0 (!%p230_p10), %v717_v2 }
  0x16   : > { %s269_s13 = scalar_select %p268_p11, %s796_s21, 1  ;;  %642 = vmatpush3.bf16.msra.mxu1 %v719_v4 }
  0x17   : > { %643 = vmatprep.subr.bf16.mxu1 %v806_v1 }
  0x18   : > { %s601_s16 = sshll.u32 %s269_s13, 3  ;;  %s941_s13 = scalar_lea.hbm %s994_s5, %s616_s8 }
  0x19   : > { %s271_s25 = scalar_lea.vmem %s989_s0, %s601_s16  ;;  %s730_s16 = sshll.u32 %s808_s15, 4  ;;  %s731_s16 = int_to_ptr.vmem [resolvable:$false] %s730_s16 }
  0x1a   : > { %v286_v5 = vld [vmem:[%s271_s25] sm:$0xff]  ;;  %644 = vmatpush3.bf16.msra.mxu1 %v720_v6  ;;  %s265_s25 = sand.u32 1, %s788_s19   ;;  %s732_s17 = scalar_lea.vmem %s731_s16, 256 }
  0x1b   : > { %v287_v7 = vpack.c.bf16 %v286_v5, %v286_v5  ;;  %645 = vmatprep.subr.bf16.mxu1 %v806_v1  ;;  %s600_s27 = sshll.u32 %s265_s25, 3  ;;  %s470_s21 = scalar_lea.sflag [#allocation3], %s265_s25 }
  0x1c   : > { %s267_s9 = scalar_lea.vmem [#allocation2], %s600_s27 }
  0x1d   : > { %636 = vmatmul.mubr.msk.bf16.vlgmr.msra.gmra.mrb[0].mxu0 %vm311_vm1, %v287_v7  ;;  %s483_s10 = sshll.u32 %s267_s9, 4  ;;  %s943_s10 = int_to_ptr.vmem [resolvable:$true] %s483_s10 }
  0x1e   : > { %646 = vmatpush3.bf16.msra.mxu1 %v721_v8  ;;  %s726_s14 = scalar_lea.vmem %s943_s10, 128  ;;  %p733_p1 = scmp.lt.s32.totalorder %s943_s10, %s731_s16 }
  0x1f   : > { %647 = vmatprep.subr.bf16.mxu1 %v806_v1  ;;  %p727_p12 = scmp.ne.s32.totalorder %s943_s10, %s726_s14  ;;  %p734_p2 = scmp.lt.s32.totalorder %s732_s17, %s726_s14 }
  0x21   : > { %p728_p13 = pnand %p727_p12, %p879_p4  ;;  %p735_p3 = por %p734_p2, %p733_p1 }
  0x22   : > { %648 = vmatpush3.bf16.msra.mxu1 %v722_v9 }
  0x23   : > { %649 = vmatprep.subr.bf16.mxu1 %v806_v1  ;;  %p729_p0 = pneg %p728_p13 }
  0x25   : > { %p736_p5 = pnand %p735_p3, %p729_p0 }
  0x26   : > { %650 = vmatpush3.bf16.msra.mxu1 %v723_v10 }
  0x27   : > { %651 = vmatprep.subr.bf16.mxu1 %v806_v1 }
  0x2a   : > { %652 = vmatpush3.bf16.msra.mxu1 %v724_v11 }
  0x2b   : > { %653 = vmatprep.subr.bf16.mxu1 %v806_v1 }
  0x2e   : > { %654 = vmatpush3.bf16.msra.mxu1 %v725_v12 }
  0xf0   : > { %v349_v14 = vpop.f32.mrb[0].mxu0 }
  0xf1   : > { %v350_v15 = vadd.f32 %v602_v13, %v349_v14  ;;  %v637_v16 = vpop.f32.mrb[1].mxu0 }
  0xf2   : > { %v352_v17 = vpop.f32.mrb[2].mxu0 }
  0xf3   : > { %v355_v18 = vmax.f32 %v350_v15, 0.0  ;;  %v638_v19 = vpop.f32.mrb[3].mxu0 }
  0xf5   : > { %v356_v20 = vpack.c.bf16 %v355_v18, %v355_v18 }
  0xf7   : > { %656 = vmatmul.mubr.bf16.vlgmr.msra.gmra.mrb[0].mxu1 %v356_v20 }
 0x1ca   : > { %v462_v22 = vpop.f32.mrb[0].mxu1 }
 0x1cb   : > { %v463_v23 = vadd.f32 %v606_v21, %v462_v22  ;;  %v657_v24 = vpop.f32.mrb[1].mxu1 }
 0x1cc   : > { %v465_v25 = vpop.f32.mrb[2].mxu1 }
 0x1cd   : > { %v658_v26 = vpop.f32.mrb[3].mxu1  ;;  %468 = vst.msk [vmem:[%s267_s9] sm:$0xff] %vm311_vm1, %v463_v23 }
 0x1ce   : > { %739 = shalt.err (!%p736_p5)
}
 0x1cf   : > { %s740_s24 = scalar_lea.hbm %s941_s13, 128  ;;  %s744_s29 = scalar_lea.hbm %s994_s5, 256 }
 0x1d0   : > { %p741_p6 = scmp.ne.s32.totalorder %s941_s13, %s740_s24  ;;  %p745_p10 = scmp.lt.u32.totalorder %s941_s13, %s994_s5 }
 0x1d1   : > { %p746_p11 = scmp.lt.u32.totalorder %s744_s29, %s740_s24  ;;  %p748_p13 = scmp.lt.u32.totalorder %s740_s24, %s941_s13 }
 0x1d2   : > { %p742_p7 = pnand %p741_p6, %p879_p4 }
 0x1d3   : > { %p747_p12 = por %p746_p11, %p745_p10 }
 0x1d4   : > { %p743_p9 = pneg %p742_p7 }
 0x1d5   : > { %p749_p0 = por %p748_p13, %p747_p12 }
 0x1d7   : > { %p750_p1 = pnand %p749_p0, %p743_p9 }
 0x1d9   : > { %753 = shalt.err (!%p750_p1)
}
 0x1da   : > { %659 = dma.vmem_to_hbm [thread:$0]  (%p879_p4), %s943_s10, 128, %s941_s13, %s470_s21  }
 0x1db PF: > { %p665_p2 = scmp.ge.s32.totalorder %s804_s23, 2  ;;  %s495_s9 = sand.u32 1, %s784_s18  }
 0x1dc   : > { %s496_s11 = scalar_lea.sflag [#allocation3], %s495_s9 }
 0x1dd   : > { %p662_p3 = pnand %p665_p2, %p886_p8 }
 0x1df   : > { %779 = dma.done.wait (!%p662_p3), %s496_s11, 128  }
 0x1e0   : > { %781 = vsyncadd (!%p662_p3), %s496_s11, 4294967168  ;;  %s18_s23 = sadd.s32 1, %s804_s23   ;;  %s997_s18 = smov %s788_s19 }
 0x1e1   : > { %p15_p5 = scmp.ge.s32.totalorder %s18_s23, 4   ;;  %s998_s19 = smov %s792_s20 }
 0x1e2   : > { %s999_s20 = smov %s892_s6  ;;  %s1000_s21 = smov %s800_s22 }
 0x1e3   : > { %s1001_s22 = smov %s1003_s26  ;;  %17 = sbr.rel (!%p15_p5) target bundleno = 4 (0x4), region = 84 }
 0x1ea   :  { %501 = vsyncpa [#allocation3], 1 }
 0x1eb   :  { %503 = vsyncpa [#allocation3 + $0x1], 1 }

// kernel: tpu_custom_call.1
= control target key start
LH: loop header
LB: loop body
LE: loop exit
PB: predicated region body
PF: predicated region fallthrough
CT: control target
= control target key end

     0   :  { %10 = vsyncpa [#allocation3], 0  ;;  %s989_s0 = inlined_call_operand.vmem [shape: f32[16,32], index: 0, kind: input, shape index: {}]   ;;  %s990_s1 = inlined_call_operand.vmem [shape: bf16[32,128], index: 1, kind: input, shape index: {}]   ;;  %s991_s2 = inlined_call_operand.vmem [shape: f32[1,128], index: 2, kind: input, shape index: {}]   ;;  %s992_s3 = inlined_call_operand.vmem [shape: bf16[128,32], index: 3, kind: input, shape index: {}]   ;;  %s993_s4 = inlined_call_operand.vmem [shape: f32[1,32], index: 4, kind: input, shape index: {}]   ;;  %s994_s5 = inlined_call_operand.hbm [shape: f32[16,32], index: 5, kind: output, shape index: {}]  }
   0x1   :  { %12 = vsyncpa [#allocation3 + $0x1], 0  ;;  %s839_s18 = smov 0   ;;  %s841_s19 = smov 0  }
   0x2   :  { %s843_s20 = smov 0   ;;  %s845_s21 = smov 0  }
   0x3   :  { %s847_s22 = smov 0   ;;  %s849_s23 = smov 0  }
   0x4 LB: > { %s592_s24 = sadd.s32 4294967295, %s804_s23   ;;  %s593_s25 = sadd.s32 4294967294, %s804_s23   ;;  %s804_s23 = sphi %s849_s23, %s18_s23   ;;  %s800_s22 = sphi %s847_s22, %s1001_s22   ;;  %s796_s21 = sphi %s845_s21, %s1000_s21   ;;  %s792_s20 = sphi %s843_s20, %s999_s20   ;;  %s788_s19 = sphi %s841_s19, %s998_s19   ;;  %s784_s18 = sphi %s839_s18, %s997_s18  }
   0x5   : > { %s30_s26 = sadd.s32 1, %s800_s22  ;;  %s162_s27 = sadd.s32 1, %s792_s20 }
   0x6   : > { %p32_p0 = scmp.ge.s32.totalorder %s30_s26, 2  ;;  %p172_p1 = scmp.ne.s32.totalorder %s792_s20, %s788_s19 }
   0x7   : > { %p173_p2 = scmp.eq.s32.totalorder %s592_s24, 1  ;;  %p178_p3 = scmp.ne.s32.totalorder %s788_s19, %s784_s18 }
   0x8   : > { %s1003_s26 = smov (%p32_p0, %s30_s26), 0  ;;  %p179_p5 = scmp.eq.s32.totalorder %s593_s25, 1 }
   0x9   : > { %p879_p4 = por %p173_p2, %p172_p1  ;;  %s159_s29 = ssub.s32 %s800_s22, %s1003_s26 }
   0xa   : > { %p599_p6 = scmp.ge.s32.totalorder %s804_s23, 1  ;;  %p160_p7 = scmp.eq.s32.totalorder %s159_s29, 0 }
   0xb   : > { %p886_p8 = por %p179_p5, %p178_p3  ;;  %p229_p9 = scmp.lt.s32.totalorder %s804_s23, 3 }
   0xc   : > { %s892_s6 = scalar_select %p160_p7, %s792_s20, %s162_s27  }
   0xd   : > { %p230_p10 = pnand %p599_p6, %p229_p9 }
   0xe   : > { %v716_v0 = vld [vmem:[%s990_s1] sm:$0xff] (!%p230_p10)   ;;  %v806_v1 = vmov (!%p230_p10), 0.0   ;;  %v717_v2 = vld [vmem:[%s990_s1 + $0x8] sm:$0xff] (!%p230_p10)   ;;  %vm807_vm0 = vmmov (!%p230_p10), 0   ;;  %p268_p11 = scmp.lt.s32.totalorder (!%p230_p10), %s796_s21, 1  ;;  %vm311_vm1 = vcmask (!%p230_p10), 261120  }
   0xf   : > { %233 = sbr.rel (%p230_p10) target bundleno = 475 (0x1db), region = 40  ;;  %631 = vmatprep.subr.bf16.mxu0 (!%p230_p10), %v806_v1  ;;  %639 = vmatprep.subr.bf16.mxu1 (!%p230_p10), %v806_v1  ;;  %v718_v3 = vld [vmem:[%s992_s3] sm:$0xff] (!%p230_p10)   ;;  %v719_v4 = vld [vmem:[%s992_s3 + $0x8] sm:$0xff] (!%p230_p10)   ;;  %v720_v6 = vld [vmem:[%s992_s3 + $0x10] sm:$0xff] (!%p230_p10)   ;;  %s616_s8 = sshll.u32 (!%p230_p10), %s796_s21, 7 }
  0x10   : > { %632 = vmatpush3.bf16.msra.mxu0 (!%p230_p10), %v716_v0  ;;  %635 = vmatprep.mubr.msk.bf16.mxu0 (!%p230_p10), %vm807_vm0, %v806_v1  ;;  %v721_v8 = vld [vmem:[%s992_s3 + $0x18] sm:$0xff] (!%p230_p10)   ;;  %v722_v9 = vld [vmem:[%s992_s3 + $0x20] sm:$0xff] (!%p230_p10)   ;;  %v723_v10 = vld [vmem:[%s992_s3 + $0x28] sm:$0xff] (!%p230_p10)   ;;  %s808_s15 = smov (!%p230_p10), [#allocation2]  }
  0x11   : > { %633 = vmatprep.subr.bf16.mxu0 (!%p230_p10), %v806_v1  ;;  %655 = vmatprep.mubr.msk.bf16.mxu1 (!%p230_p10), %vm807_vm0, %v806_v1  ;;  %v724_v11 = vld [vmem:[%s992_s3 + $0x30] sm:$0xff] (!%p230_p10)   ;;  %v725_v12 = vld [vmem:[%s992_s3 + $0x38] sm:$0xff] (!%p230_p10)   ;;  %v602_v13 = vld [vmem:[%s991_s2] ss:$0 sm:$0xff] (!%p230_p10) }
  0x12   : > { %640 = vmatpush3.bf16.msra.mxu1 (!%p230_p10), %v718_v3  ;;  %v606_v21 = vld [vmem:[%s993_s4] ss:$0 sm:$0xff] (!%p230_p10) }
  0x13   : > { %641 = vmatprep.subr.bf16.mxu1 (!%p230_p10), %v806_v1 }
  0x14   : > { %634 = vmatpush3.bf16.msra.mxu0 (!%p230_p10), %v717_v2 }
  0x16   : > { %s269_s13 = scalar_select %p268_p11, %s796_s21, 1  ;;  %642 = vmatpush3.bf16.msra.mxu1 %v719_v4 }
  0x17   : > { %643 = vmatprep.subr.bf16.mxu1 %v806_v1 }
  0x18   : > { %s601_s16 = sshll.u32 %s269_s13, 3  ;;  %s941_s13 = scalar_lea.hbm %s994_s5, %s616_s8 }
  0x19   : > { %s271_s25 = scalar_lea.vmem %s989_s0, %s601_s16  ;;  %s730_s16 = sshll.u32 %s808_s15, 4  ;;  %s731_s16 = int_to_ptr.vmem [resolvable:$false] %s730_s16 }
  0x1a   : > { %v286_v5 = vld [vmem:[%s271_s25] sm:$0xff]  ;;  %644 = vmatpush3.bf16.msra.mxu1 %v720_v6  ;;  %s265_s25 = sand.u32 1, %s788_s19   ;;  %s732_s17 = scalar_lea.vmem %s731_s16, 256 }
  0x1b   : > { %v287_v7 = vpack.c.bf16 %v286_v5, %v286_v5  ;;  %645 = vmatprep.subr.bf16.mxu1 %v806_v1  ;;  %s600_s27 = sshll.u32 %s265_s25, 3  ;;  %s470_s21 = scalar_lea.sflag [#allocation3], %s265_s25 }
  0x1c   : > { %s267_s9 = scalar_lea.vmem [#allocation2], %s600_s27 }
  0x1d   : > { %636 = vmatmul.mubr.msk.bf16.vlgmr.msra.gmra.mrb[0].mxu0 %vm311_vm1, %v287_v7  ;;  %s483_s10 = sshll.u32 %s267_s9, 4  ;;  %s943_s10 = int_to_ptr.vmem [resolvable:$true] %s483_s10 }
  0x1e   : > { %646 = vmatpush3.bf16.msra.mxu1 %v721_v8  ;;  %s726_s14 = scalar_lea.vmem %s943_s10, 128  ;;  %p733_p1 = scmp.lt.s32.totalorder %s943_s10, %s731_s16 }
  0x1f   : > { %647 = vmatprep.subr.bf16.mxu1 %v806_v1  ;;  %p727_p12 = scmp.ne.s32.totalorder %s943_s10, %s726_s14  ;;  %p734_p2 = scmp.lt.s32.totalorder %s732_s17, %s726_s14 }
  0x21   : > { %p728_p13 = pnand %p727_p12, %p879_p4  ;;  %p735_p3 = por %p734_p2, %p733_p1 }
  0x22   : > { %648 = vmatpush3.bf16.msra.mxu1 %v722_v9 }
  0x23   : > { %649 = vmatprep.subr.bf16.mxu1 %v806_v1  ;;  %p729_p0 = pneg %p728_p13 }
  0x25   : > { %p736_p5 = pnand %p735_p3, %p729_p0 }
  0x26   : > { %650 = vmatpush3.bf16.msra.mxu1 %v723_v10 }
  0x27   : > { %651 = vmatprep.subr.bf16.mxu1 %v806_v1 }
  0x2a   : > { %652 = vmatpush3.bf16.msra.mxu1 %v724_v11 }
  0x2b   : > { %653 = vmatprep.subr.bf16.mxu1 %v806_v1 }
  0x2e   : > { %654 = vmatpush3.bf16.msra.mxu1 %v725_v12 }
  0xf0   : > { %v349_v14 = vpop.f32.mrb[0].mxu0 }
  0xf1   : > { %v350_v15 = vadd.f32 %v602_v13, %v349_v14  ;;  %v637_v16 = vpop.f32.mrb[1].mxu0 }
  0xf2   : > { %v352_v17 = vpop.f32.mrb[2].mxu0 }
  0xf3   : > { %v355_v18 = vmax.f32 %v350_v15, 0.0  ;;  %v638_v19 = vpop.f32.mrb[3].mxu0 }
  0xf5   : > { %v356_v20 = vpack.c.bf16 %v355_v18, %v355_v18 }
  0xf7   : > { %656 = vmatmul.mubr.bf16.vlgmr.msra.gmra.mrb[0].mxu1 %v356_v20 }
 0x1ca   : > { %v462_v22 = vpop.f32.mrb[0].mxu1 }
 0x1cb   : > { %v463_v23 = vadd.f32 %v606_v21, %v462_v22  ;;  %v657_v24 = vpop.f32.mrb[1].mxu1 }
 0x1cc   : > { %v465_v25 = vpop.f32.mrb[2].mxu1 }
 0x1cd   : > { %v658_v26 = vpop.f32.mrb[3].mxu1  ;;  %468 = vst.msk [vmem:[%s267_s9] sm:$0xff] %vm311_vm1, %v463_v23 }
 0x1ce   : > { %739 = shalt.err (!%p736_p5)
}
 0x1cf   : > { %s740_s24 = scalar_lea.hbm %s941_s13, 128  ;;  %s744_s29 = scalar_lea.hbm %s994_s5, 256 }
 0x1d0   : > { %p741_p6 = scmp.ne.s32.totalorder %s941_s13, %s740_s24  ;;  %p745_p10 = scmp.lt.u32.totalorder %s941_s13, %s994_s5 }
 0x1d1   : > { %p746_p11 = scmp.lt.u32.totalorder %s744_s29, %s740_s24  ;;  %p748_p13 = scmp.lt.u32.totalorder %s740_s24, %s941_s13 }
 0x1d2   : > { %p742_p7 = pnand %p741_p6, %p879_p4 }
 0x1d3   : > { %p747_p12 = por %p746_p11, %p745_p10 }
 0x1d4   : > { %p743_p9 = pneg %p742_p7 }
 0x1d5   : > { %p749_p0 = por %p748_p13, %p747_p12 }
 0x1d7   : > { %p750_p1 = pnand %p749_p0, %p743_p9 }
 0x1d9   : > { %753 = shalt.err (!%p750_p1)
}
 0x1da   : > { %659 = dma.vmem_to_hbm [thread:$0]  (%p879_p4), %s943_s10, 128, %s941_s13, %s470_s21  }
 0x1db PF: > { %p665_p2 = scmp.ge.s32.totalorder %s804_s23, 2  ;;  %s495_s9 = sand.u32 1, %s784_s18  }
 0x1dc   : > { %s496_s11 = scalar_lea.sflag [#allocation3], %s495_s9 }
 0x1dd   : > { %p662_p3 = pnand %p665_p2, %p886_p8 }
 0x1df   : > { %779 = dma.done.wait (!%p662_p3), %s496_s11, 128  }
 0x1e0   : > { %781 = vsyncadd (!%p662_p3), %s496_s11, 4294967168  ;;  %s18_s23 = sadd.s32 1, %s804_s23   ;;  %s997_s18 = smov %s788_s19 }
 0x1e1   : > { %p15_p5 = scmp.ge.s32.totalorder %s18_s23, 4   ;;  %s998_s19 = smov %s792_s20 }
 0x1e2   : > { %s999_s20 = smov %s892_s6  ;;  %s1000_s21 = smov %s800_s22 }
 0x1e3   : > { %s1001_s22 = smov %s1003_s26  ;;  %17 = sbr.rel (!%p15_p5) target bundleno = 4 (0x4), region = 84 }
 0x1ea   :  { %501 = vsyncpa [#allocation3], 1 }
 0x1eb   :  { %503 = vsyncpa [#allocation3 + $0x1], 1 }

</bundles_post_ra>
